<compile_context>
chip_gen: v6e
topology: v6e:2x2x1
jax: 0.10.0
libtpu: 0.0.40
codegen_flags: <defaults>
</compile_context>

<pallas_src>
import math

import jax
import jax.numpy as jnp
from jax.experimental import pallas as pl
from jax.experimental.pallas import tpu as pltpu


# ------------------------------ helpers --------------------------------------
def _round_up(v, m):
    return (v + m - 1) // m * m


def _vmem_tile_bytes(rows, cols, dtype):
    """VMEM footprint of a (rows, cols) buffer including (8,128)-family padding."""
    itemsize = jnp.dtype(dtype).itemsize
    sublane_pack = max(1, 4 // itemsize)          # f32: 8, bf16: 16, int8: 32 rows
    r = _round_up(max(rows, 1), 8 * sublane_pack)
    c = _round_up(max(cols, 1), 128)
    return r * c * itemsize


# ----------------------------- Pallas kernels ---------------------------------
def _linear_kernel(x_ref, w_ref, b_ref, o_ref):
    # x_ref: (TM, K), w_ref: (K, TN) pre-transposed lane-dense, b_ref: (1, TN) f32
    acc = jnp.dot(x_ref[...], w_ref[...], preferred_element_type=jnp.float32)
    o_ref[...] = (acc + b_ref[...]).astype(o_ref.dtype)


def _linear_kernel_ktiled(x_ref, w_ref, b_ref, o_ref, acc_ref):
    # Same as above but with a K ('arbitrary', innermost) grid axis and an
    # f32 accumulator tile (pattern P3).
    k = pl.program_id(2)

    @pl.when(k == 0)
    def _():
        acc_ref[...] = jnp.zeros_like(acc_ref)

    acc_ref[...] += jnp.dot(x_ref[...], w_ref[...],
                            preferred_element_type=jnp.float32)

    @pl.when(k == pl.num_programs(2) - 1)
    def _():
        o_ref[...] = (acc_ref[...] + b_ref[...]).astype(o_ref.dtype)


# ------------------- one-time parameter preparation (init) --------------------
def prepare_linear_params(weight, bias=None, *, param_dtype=None,
                          k_tile_threshold=2048, tile_k=512):
    """Do at module init, NOT per forward: cast, pre-transpose to (K, N) so the
    weight tile is lane-dense (lanes = out channels), pad N to a multiple of
    128 (lane-dense unmasked stores), and pad K when the K-tiled path is used.
    """
    out_channels, in_channels = weight.shape
    w = weight if param_dtype is None else weight.astype(param_dtype)
    w_t = jnp.transpose(w)                               # (K, N)

    n_pad = _round_up(out_channels, 128)
    use_k_tiling = in_channels > k_tile_threshold
    if use_k_tiling:
        tile_k_eff = min(_round_up(tile_k, 128), _round_up(in_channels, 128))
        k_pad = _round_up(in_channels, tile_k_eff)
    else:
        tile_k_eff = None
        k_pad = in_channels

    pad_k = k_pad - in_channels
    pad_n = n_pad - out_channels
    if pad_k or pad_n:
        w_t = jnp.pad(w_t, ((0, pad_k), (0, pad_n)))

    if bias is None:
        b_row = jnp.zeros((1, n_pad), jnp.float32)
    else:
        b_row = bias.astype(jnp.float32).reshape(1, out_channels)
        if pad_n:
            b_row = jnp.pad(b_row, ((0, 0), (0, pad_n)))

    return dict(w=w_t, b=b_row, out_channels=out_channels,
                in_channels=in_channels, tile_k=tile_k_eff,
                param_dtype=param_dtype)


# --------------------------------- forward ------------------------------------
def pallas_linear(x, params, *, tile_m=None, tile_n=512, out_dtype=None,
                  vmem_fraction=0.75):
    """y = F.linear(x, weight, bias) with pre-prepared params (see above)."""
    w = params["w"]                       # (k_pad, n_pad), pre-transposed
    b_row = params["b"]                   # (1, n_pad), f32
    out_channels = params["out_channels"]
    in_channels = params["in_channels"]
    tile_k = params["tile_k"]
    param_dtype = params["param_dtype"]
    k_pad, n_pad = w.shape

    assert x.shape[-1] == in_channels
    lead_shape = x.shape[:-1]
    m = int(math.prod(lead_shape)) if lead_shape else 1
    x2d = x.reshape(m, in_channels)

    # Stream activations at the (possibly reduced) operand width.
    # TODO(synk): in a full model keep activations in param_dtype upstream so
    # this cast fuses into the producer instead of an extra HBM pass here.
    if param_dtype is not None and x2d.dtype != param_dtype:
        x2d = x2d.astype(param_dtype)
    x_dtype = x2d.dtype
    if out_dtype is None:
        out_dtype = x_dtype

    # ---- M tiling: dtype-aware sublane alignment, large tiles for small K ----
    sub_align = 8 * max(1, 4 // jnp.dtype(x_dtype).itemsize)   # 8 f32 / 16 bf16
    if tile_m is None:
        row_bytes = max(k_pad * jnp.dtype(x_dtype).itemsize, 1)
        tile_m = max(256, min(1024, (2 << 20) // row_bytes))   # ~2 MiB x tile
    tile_m_eff = min(_round_up(tile_m, sub_align), _round_up(m, sub_align))

    # ---- N tiling: multiple of 128 that divides n_pad exactly ----
    tile_n_eff = math.gcd(_round_up(max(tile_n, 128), 128), n_pad)

    grid_m = pl.cdiv(m, tile_m_eff)
    grid_n = n_pad // tile_n_eff

    # v7x megacore: keep >= 2 parallel grid entries when M is worth splitting.
    if grid_m * grid_n == 1 and m >= 2 * sub_align:
        tile_m_eff = _round_up(pl.cdiv(m, 2), sub_align)
        grid_m = pl.cdiv(m, tile_m_eff)

    m_pad = grid_m * tile_m_eff
    pad_m = m_pad - m
    pad_k = k_pad - in_channels
    if pad_m or pad_k:
        x2d = jnp.pad(x2d, ((0, pad_m), (0, pad_k)))

    # ---- VMEM budget (accounts for lane/sublane padding + accumulator) ----
    w_dtype = w.dtype
    if tile_k is None:
        x_blk = _vmem_tile_bytes(tile_m_eff, k_pad, x_dtype)
        w_blk = _vmem_tile_bytes(k_pad, tile_n_eff, w_dtype)
        acc_scratch = 0
    else:
        x_blk = _vmem_tile_bytes(tile_m_eff, tile_k, x_dtype)
        w_blk = _vmem_tile_bytes(tile_k, tile_n_eff, w_dtype)
        acc_scratch = _vmem_tile_bytes(tile_m_eff, tile_n_eff, jnp.float32)
    b_blk = _vmem_tile_bytes(1, tile_n_eff, jnp.float32)
    o_blk = _vmem_tile_bytes(tile_m_eff, tile_n_eff, out_dtype)
    est = 2 * (x_blk + w_blk + b_blk + o_blk) + acc_scratch + (1 << 20)
    try:
        vmem_cap = pltpu.get_tpu_info().vmem_capacity_bytes
    except Exception:
        vmem_cap = 64 << 20
    vmem_limit = int(min(max(est, 32 << 20), vmem_fraction * vmem_cap))

    cost = pl.CostEstimate(
        flops=2 * m_pad * k_pad * n_pad,
        transcendentals=0,
        bytes_accessed=(m_pad * k_pad * jnp.dtype(x_dtype).itemsize
                        + k_pad * n_pad * jnp.dtype(w_dtype).itemsize
                        + m_pad * n_pad * jnp.dtype(out_dtype).itemsize),
    )

    out_shape = jax.ShapeDtypeStruct((m_pad, n_pad), out_dtype)

    if tile_k is None:
        # 2-D grid; order chosen so the larger operand is streamed only once.
        x_bytes = m_pad * k_pad * jnp.dtype(x_dtype).itemsize
        w_bytes = k_pad * n_pad * jnp.dtype(w_dtype).itemsize
        if grid_n == 1 or x_bytes >= w_bytes:
            # M outer: x fetched once total, weight slab refetched per M tile.
            grid = (grid_m, grid_n)
            in_specs = [
                pl.BlockSpec((tile_m_eff, k_pad), lambda i, j: (i, 0)),
                pl.BlockSpec((k_pad, tile_n_eff), lambda i, j: (0, j)),
                pl.BlockSpec((1, tile_n_eff), lambda i, j: (0, j)),
            ]
            out_specs = pl.BlockSpec((tile_m_eff, tile_n_eff),
                                     lambda i, j: (i, j))
        else:
            # N outer: weight fetched once total, x refetched per N tile.
            grid = (grid_n, grid_m)
            in_specs = [
                pl.BlockSpec((tile_m_eff, k_pad), lambda j, i: (i, 0)),
                pl.BlockSpec((k_pad, tile_n_eff), lambda j, i: (j, 0)),
                pl.BlockSpec((1, tile_n_eff), lambda j, i: (0, j)),
            ]
            out_specs = pl.BlockSpec((tile_m_eff, tile_n_eff),
                                     lambda j, i: (i, j))
        out = pl.pallas_call(
            _linear_kernel,
            out_shape=out_shape,
            grid_spec=pltpu.PrefetchScalarGridSpec(
                num_scalar_prefetch=0,
                grid=grid,
                in_specs=in_specs,
                out_specs=out_specs,
            ),
            compiler_params=pltpu.CompilerParams(
                dimension_semantics=("parallel", "parallel"),
                vmem_limit_bytes=vmem_limit,
            ),
            cost_estimate=cost,
        )(x2d, w, b_row)
    else:
        # 3-D grid with innermost K reduction and an f32 accumulator tile.
        grid_k = k_pad // tile_k
        out = pl.pallas_call(
            _linear_kernel_ktiled,
            out_shape=out_shape,
            grid_spec=pltpu.PrefetchScalarGridSpec(
                num_scalar_prefetch=0,
                grid=(grid_m, grid_n, grid_k),
                in_specs=[
                    pl.BlockSpec((tile_m_eff, tile_k), lambda i, j, k: (i, k)),
                    pl.BlockSpec((tile_k, tile_n_eff), lambda i, j, k: (k, j)),
                    pl.BlockSpec((1, tile_n_eff), lambda i, j, k: (0, j)),
                ],
                out_specs=pl.BlockSpec((tile_m_eff, tile_n_eff),
                                       lambda i, j, k: (i, j)),
                scratch_shapes=[pltpu.VMEM((tile_m_eff, tile_n_eff),
                                           jnp.float32)],
            ),
            compiler_params=pltpu.CompilerParams(
                dimension_semantics=("parallel", "parallel", "arbitrary"),
                vmem_limit_bytes=vmem_limit,
            ),
            cost_estimate=cost,
        )(x2d, w, b_row)

    out = out[:m, :out_channels]
    return out.reshape(*lead_shape, out_channels)


# ------------------------- parameter initialization ---------------------------
def glorot_uniform(key, out_channels, in_channels, dtype=jnp.float32):
    # torch_geometric inits.glorot: uniform(-a, a), a = sqrt(6/(fan_in+fan_out))
    a = math.sqrt(6.0 / (in_channels + out_channels))
    return jax.random.uniform(
        key, (out_channels, in_channels), minval=-a, maxval=a, dtype=dtype)


# ----------------------------------- main --------------------------------------
if __name__ == "__main__":
    key = jax.random.PRNGKey(0)
    k_x, k_w, k_x2, k_w3, k_x3, k_b3 = jax.random.split(key, 6)

    # ---- Case 1: tiny GNN-block layer, f32 (matches the module defaults) ----
    # TODO(synk): at this size a standalone kernel launch is overhead-dominated;
    # in the full model fuse this Linear with the surrounding block ops.
    in_channels, out_channels, batch = 32, 64, 8
    weight = glorot_uniform(k_w, out_channels, in_channels)
    bias = jnp.zeros((out_channels,), jnp.float32)
    x = jax.random.normal(k_x, (batch, in_channels), jnp.float32)

    params = prepare_linear_params(weight, bias)          # once, at init
    y = jax.block_until_ready(pallas_linear(x, params))
    y_ref = jnp.dot(x, weight.T, precision="highest") + bias
    assert y.shape == (batch, out_channels)
    assert jnp.allclose(y, y_ref, atol=1e-4, rtol=1e-4)

    # ---- Case 2: bf16 operands + bf16 output, larger M (multi-tile grid) ----
    m2 = 512
    x2 = jax.random.normal(k_x2, (m2, in_channels), jnp.float32)
    params_bf16 = prepare_linear_params(weight, bias, param_dtype=jnp.bfloat16)
    y2 = jax.block_until_ready(
        pallas_linear(x2, params_bf16, out_dtype=jnp.bfloat16))
    y2_ref = jnp.dot(x2, weight.T, precision="highest") + bias
    assert y2.shape == (m2, out_channels) and y2.dtype == jnp.bfloat16
    assert jnp.allclose(y2.astype(jnp.float32), y2_ref, atol=5e-2, rtol=5e-2)

    # ---- Case 3: K-tiled accumulator path (forced with a small threshold) ----
    in3, out3, m3 = 384, 256, 256
    w3 = glorot_uniform(k_w3, out3, in3)
    b3 = jax.random.normal(k_b3, (out3,), jnp.float32) * 0.1
    x3 = jax.random.normal(k_x3, (m3, in3), jnp.float32)
    params3 = prepare_linear_params(w3, b3, k_tile_threshold=256, tile_k=128)
    y3 = jax.block_until_ready(pallas_linear(x3, params3))
    y3_ref = jnp.dot(x3, w3.T, precision="highest") + b3
    assert y3.shape == (m3, out3)
    assert jnp.allclose(y3, y3_ref, atol=5e-3, rtol=5e-3)

    print("KERNEL_OK")
</pallas_src>

<mosaic_0001>
module attributes {stable_mosaic.version = 11 : i64} {
  func.func @_linear_kernel(%arg0: i32, %arg1: i32, %arg2: memref<8x32xf32, #tpu.memory_space<vmem>>, %arg3: memref<32x128xf32, #tpu.memory_space<vmem>>, %arg4: memref<1x128xf32, #tpu.memory_space<vmem>>, %arg5: memref<8x128xf32, #tpu.memory_space<vmem>>) attributes {dimension_semantics = [#tpu.dimension_semantics<parallel>, #tpu.dimension_semantics<parallel>], iteration_bounds = array<i64: 1, 1>, scalar_prefetch = 0 : i64, scratch_operands = 0 : i64, tpu.core_type = #tpu.core_type<tc>, window_params = [{transform_indices = @transform_0, window_bounds = array<i64: 8, 32>}, {transform_indices = @transform_1, window_bounds = array<i64: 32, 128>}, {transform_indices = @transform_2, window_bounds = array<i64: 1, 128>}, {transform_indices = @transform_3, window_bounds = array<i64: 8, 128>}]} {
    %c0 = arith.constant 0 : index
    %c0_0 = arith.constant 0 : index
    %0 = vector.load %arg2[%c0, %c0_0] : memref<8x32xf32, #tpu.memory_space<vmem>>, vector<8x32xf32>
    %c0_1 = arith.constant 0 : index
    %c0_2 = arith.constant 0 : index
    %1 = vector.load %arg3[%c0_1, %c0_2] : memref<32x128xf32, #tpu.memory_space<vmem>>, vector<32x128xf32>
    %cst = arith.constant dense<0.000000e+00> : vector<8x128xf32>
    %2 = tpu.matmul %0, %1, %cst {dimension_numbers = #tpu.dot_dimension_numbers<[1], [0], [0], [1], [0, 0, 1, 1], [], []>} : vector<8x32xf32>, vector<32x128xf32>, vector<8x128xf32> -> vector<8x128xf32>
    %c0_3 = arith.constant 0 : index
    %c0_4 = arith.constant 0 : index
    %3 = vector.load %arg4[%c0_3, %c0_4] : memref<1x128xf32, #tpu.memory_space<vmem>>, vector<1x128xf32>
    %4 = vector.broadcast %3 : vector<1x128xf32> to vector<8x128xf32>
    %5 = arith.addf %2, %4 : vector<8x128xf32>
    %c0_5 = arith.constant 0 : index
    %c0_6 = arith.constant 0 : index
    %6 = vector.load %arg5[%c0_5, %c0_6] : memref<8x128xf32, #tpu.memory_space<vmem>>, vector<8x128xf32>
    tpu.vector_store %arg5[%c0_5, %c0_6], %5 {strides = array<i32>} : memref<8x128xf32, #tpu.memory_space<vmem>>, vector<8x128xf32>,
    return
  }
  func.func @transform_0(%arg0: i32, %arg1: i32) -> (i32, i32) {
    %c0_i32 = arith.constant 0 : i32
    %c0_i32_0 = arith.constant 0 : i32
    return %arg0, %c0_i32 : i32, i32
  }
  func.func @transform_1(%arg0: i32, %arg1: i32) -> (i32, i32) {
    %c0_i32 = arith.constant 0 : i32
    %c0_i32_0 = arith.constant 0 : i32
    return %c0_i32, %arg1 : i32, i32
  }
  func.func @transform_2(%arg0: i32, %arg1: i32) -> (i32, i32) {
    %c0_i32 = arith.constant 0 : i32
    %c0_i32_0 = arith.constant 0 : i32
    return %c0_i32, %arg1 : i32, i32
  }
  func.func @transform_3(%arg0: i32, %arg1: i32) -> (i32, i32) {
    %c0_i32 = arith.constant 0 : i32
    return %arg0, %arg1 : i32, i32
  }
}

</mosaic_0001>

<bundles_post_ra>
// kernel: tpu_custom_call.1
= control target key start
LH: loop header
LB: loop body
LE: loop exit
PB: predicated region body
PF: predicated region fallthrough
CT: control target
= control target key end

     0   :  { %8 = vsyncpa [#allocation3], 0  ;;  %s274_s0 = inlined_call_operand.hbm [shape: f32[8,32], index: 0, kind: input, shape index: {}]   ;;  %s275_s1 = inlined_call_operand.hbm [shape: f32[32,128], index: 1, kind: input, shape index: {}]   ;;  %s276_s2 = inlined_call_operand.vmem [shape: f32[1,128], index: 2, kind: input, shape index: {}]   ;;  %s277_s3 = inlined_call_operand.hbm [shape: f32[8,128], index: 3, kind: output, shape index: {}]  }
   0x1   :  { %9 = vsyncpa [#allocation6], 0 }
   0x2   :  { %10 = vsyncpa [#allocation4], 0  ;;  %s235_s12 = smov [#allocation2]   ;;  %s236_s14 = smov [#allocation5]  }
   0x3   :  { %s17_s13 = sshll.u32 %s235_s12, 4  ;;  %s26_s15 = sshll.u32 %s236_s14, 4  ;;  %s18_s13 = int_to_ptr.vmem [resolvable:$true] %s17_s13  ;;  %s27_s15 = int_to_ptr.vmem [resolvable:$true] %s26_s15 }
   0x4   :  { %s177_s16 = scalar_lea.vmem %s18_s13, 128  ;;  %p182_p1 = scmp.lt.s32.totalorder %s18_s13, %s18_s13 }
   0x5   :  { %p178_p0 = scmp.ne.s32.totalorder %s18_s13, %s177_s16  ;;  %p183_p2 = scmp.lt.s32.totalorder %s177_s16, %s177_s16 }
   0x7   :  { %p184_p3 = por %p183_p2, %p182_p1 }
   0x9   :  { %p185_p4 = pnand %p184_p3, %p178_p0 }
   0xb   :  { %188 = shalt.err (!%p185_p4)
}
   0xc   :  { %20 = dma.hbm_to_vmem [thread:$0]  %s274_s0, 128, %s18_s13, [#allocation3]  }
   0xd   :  { %s197_s19 = scalar_lea.vmem %s27_s15, 512  ;;  %p202_p6 = scmp.lt.s32.totalorder %s27_s15, %s27_s15 }
   0xe   :  { %p198_p5 = scmp.ne.s32.totalorder %s27_s15, %s197_s19  ;;  %p203_p7 = scmp.lt.s32.totalorder %s197_s19, %s197_s19 }
  0x10   :  { %p204_p8 = por %p203_p7, %p202_p6 }
  0x12   :  { %p205_p9 = pnand %p204_p8, %p198_p5 }
  0x14   :  { %208 = shalt.err (!%p205_p9)
}
  0x15   :  { %s237_s20 = smov 128   ;;  %s238_s21 = smov 8  }
  0x16   :  { %32 = dma.hbm_to_vmem [thread:$0]  %s275_s1, 512, %s27_s15, [#allocation6], %s237_s20, %s237_s20, %s238_s21  }
  0x17   :  { %229 = dma.done.wait [#allocation3], 128  }
  0x18   :  { %230 = vsyncadd [#allocation3], 4294967168 }
  0x19   :  { %231 = dma.done.wait [#allocation6], 512  }
  0x1a   :  { %232 = vsyncadd [#allocation6], 4294966784  ;;  %v239_v0 = vmov 0.0   ;;  %vm240_vm0 = vmmov 0   ;;  %v45_v1 = vld [vmem:[#allocation5 + $0x18] sm:$0xff]  ;;  %v44_v2 = vld [vmem:[#allocation5 + $0x10] sm:$0xff] }
  0x1b   :  { %151 = vmatprep.subr.mxu0 %v239_v0  ;;  %159 = vmatprep.mubr.msk.f32.mxu0 %vm240_vm0, %v239_v0  ;;  %v43_v3 = vld [vmem:[#allocation5 + $0x8] sm:$0xff]  ;;  %v42_v4 = vld [vmem:[#allocation5] sm:$0xff]  ;;  %v41_v5 = vld [vmem:[#allocation2] sm:$0xff]  ;;  %vm53_vm1 = vcmask 261120   ;;  %s241_s24 = smov [#allocation7]  }
  0x1c   :  { %152 = vmatpush3.msra.mxu0 %v45_v1  ;;  %v144_v6 = vld [vmem:[%s276_s2] ss:$0 sm:$0xff]  ;;  %s134_s25 = sshll.u32 %s241_s24, 4  ;;  %s135_s25 = int_to_ptr.vmem [resolvable:$true] %s134_s25 }
  0x1d   :  { %153 = vmatprep.subr.mxu0 %v239_v0  ;;  %s209_s26 = scalar_lea.vmem %s135_s25, 128  ;;  %p214_p11 = scmp.lt.s32.totalorder %s135_s25, %s135_s25 }
  0x1e   :  { %154 = vmatpush3.msra.mxu0 %v44_v2  ;;  %p210_p10 = scmp.ne.s32.totalorder %s135_s25, %s209_s26  ;;  %p215_p12 = scmp.lt.s32.totalorder %s209_s26, %s209_s26 }
  0x1f   :  { %155 = vmatprep.subr.mxu0 %v239_v0 }
  0x20   :  { %156 = vmatpush3.msra.mxu0 %v43_v3  ;;  %p216_p13 = por %p215_p12, %p214_p11 }
  0x21   :  { %157 = vmatprep.subr.mxu0 %v239_v0 }
  0x22   :  { %158 = vmatpush3.msra.mxu0 %v42_v4  ;;  %p217_p0 = pnand %p216_p13, %p210_p10 }
  0x23   :  { %160 = vmatmul.mubr.msk.f32.vlgmr.msra.gmra.mxu0 %vm53_vm1, %v41_v5 }
  0xe3   :  { %v123_v7 = vpop.f32.mrf.mxu0 }
  0xe4   :  { %v124_v8 = vadd.f32 %v144_v6, %v123_v7 }
  0xe5   :  { %v161_v9 = vpop.f32.mrf.mxu0 }
  0xe6   :  { %127 = vst [vmem:[#allocation7] sm:$0xff] %v124_v8 }
  0xe7   :  { %220 = shalt.err (!%p217_p0)
}
  0xe8   :  { %137 = dma.vmem_to_hbm [thread:$0]  %s135_s25, 128, %s277_s3, [#allocation4]  }
  0xe9   :  { %233 = dma.done.wait [#allocation4], 128  }
  0xea   :  { %234 = vsyncadd [#allocation4], 4294967168 }
  0xeb   :  { %141 = vsyncpa [#allocation3], 1 }
  0xec   :  { %142 = vsyncpa [#allocation6], 1 }
  0xed   :  { %143 = vsyncpa [#allocation4], 1 }

</bundles_post_ra>
